<compile_context>
chip_gen: v5e
topology: v5e:2x2
jax: 0.10.0
libtpu: 0.0.40
codegen_flags: <defaults>
</compile_context>

<pallas_src>
import functools

import jax
import jax.numpy as jnp
import numpy as np
from jax.experimental import pallas as pl
from jax.experimental.pallas import tpu as pltpu


def conv_relu_kernel(x_ref, w_ref, b_ref, o_ref, rhs_ref, *,
                     kh, kw, Wp, H_out, W_out, L, nb):
    """nb batch elements: o = ReLU(W @ im2col(x) + b), crop fused into stores.

    x_ref:   (nb, C_in, Lf)           bf16  flattened zero-padded images (+ slack row)
    w_ref:   (C_out, K)               bf16  K = kh*kw*C_in, K rows ordered (i, j, c)
    b_ref:   (C_out, 1)               f32
    o_ref:   (nb, C_out, H_out*W_out)       cropped, lane-dense output
    rhs_ref: (K, nb*L)                bf16  VMEM scratch, L = H_out*Wp
    """
    c_in = x_ref.shape[1]

    # 1) Stack the kh*kw shifted taps of each image into the (K, nb*L) RHS
    #    scratch — one explicit VMEM copy per tap (store/XLU work; MXU idle).
    for n in range(nb):                               # unrolled at trace time
        xn = x_ref[n]                                 # (C_in, Lf) in VMEM
        for i in range(kh):
            for j in range(kw):
                tap = i * kw + j
                off = i * Wp + j                      # static lane offset
                rhs_ref[tap * c_in:(tap + 1) * c_in,
                        n * L:(n + 1) * L] = xn[:, off:off + L]

    # 2) One MXU GEMM with full contraction depth K = kh*kw*C_in; f32
    #    accumulation happens inside the systolic array.
    acc = jnp.dot(w_ref[...], rhs_ref[...],
                  preferred_element_type=jnp.float32)        # (C_out, nb*L)

    # 3) Bias + ReLU in one fused f32 VALU pass (no per-tap accumulator left,
    #    so the bias "init" fold is simply this single add).
    acc = jnp.maximum(acc + b_ref[...], 0.0)

    # 4) Fused crop: drop the kw-1 garbage columns of each padded row while
    #    storing, so the HBM-bound output block is exactly (C_out, H_out*W_out)
    #    and lane-dense.  Per-row masked VMEM stores are cheap; the HBM DMA of
    #    the whole block stays unmasked and exact-sized.
    for n in range(nb):
        for y in range(H_out):
            row = acc[:, n * L + y * Wp: n * L + y * Wp + W_out]
            o_ref[n, :, y * W_out:(y + 1) * W_out] = row.astype(o_ref.dtype)


def _vmem_capacity_bytes():
    try:
        cap = getattr(pltpu.get_tpu_info(), "vmem_capacity_bytes", None)
        if cap:
            return int(cap)
    except Exception:
        pass
    return 64 << 20          # conservative: v7x per-TensorCore VMEM


def conv_module_forward(x, weight, bias, *, stride=1, padding=1,
                        out_dtype=jnp.float32):
    """ConvModule.forward (conv -> act): ReLU(Conv2d(x)) on NCHW f32 input."""
    if stride != 1:
        # TODO(synk): stride>1 / dilation>1 / groups>1 are not implemented in
        # the fused flat-spatial formulation (ConvModule defaults are covered).
        raise NotImplementedError("only stride=1, dilation=1, groups=1 supported")
    N, C_in, H, W = x.shape
    C_out, C_in_w, kh, kw = weight.shape
    assert C_in_w == C_in, "groups != 1 not supported"

    Hp, Wp = H + 2 * padding, W + 2 * padding
    H_out, W_out = Hp - kh + 1, Wp - kw + 1
    L = H_out * Wp                # padded row-major span used by the GEMM
    L_out = H_out * W_out         # cropped, lane-dense output span
    Lf = (Hp + 1) * Wp            # +1 slack row keeps every tap slice in-bounds
    K = kh * kw * C_in
    out_bytes = np.dtype(out_dtype).itemsize

    # --- glue: bf16 cast + spatial zero-pad (XLA fuses these into one pass),
    # flatten H*W (free reshape).
    # TODO(synk): for production image sizes avoid this materialized padded
    # copy entirely (memory_space=pl.ANY input + DMA rows into a pre-zeroed
    # VMEM slab inside the kernel).
    xp = jnp.pad(x.astype(jnp.bfloat16),
                 ((0, 0), (0, 0), (padding, padding + 1), (padding, padding)))
    x_flat = xp.reshape(N, C_in, Lf)

    # Weight as (C_out, K) with K ordered (i, j, c) to match the RHS stacking.
    w2 = weight.astype(jnp.bfloat16).transpose(0, 2, 3, 1).reshape(C_out, K)
    b2 = bias.astype(jnp.float32).reshape(C_out, 1)

    # --- VMEM budget & batch-block size (nb images per grid step) -----------
    vmem_cap = _vmem_capacity_bytes()
    budget = (vmem_cap * 3) // 4          # ~48 MiB on v7x, ~96 MiB on v5e/v6e
    fixed = 2 * (C_out * K * 2 + C_out * 4) + (2 << 20)     # weights/bias + slack
    per_img = (2 * C_in * Lf * 2                  # double-buffered input block
               + 2 * C_out * L_out * out_bytes    # double-buffered output block
               + K * L * 2                        # stacked-RHS VMEM scratch
               + C_out * L * 4)                   # f32 GEMM result headroom
    target_nb = max(1, N // 4)            # keep >= 4 grid steps when N allows
    nb = 1                                # (>= 2 per v7x TensorCore)
    for d in range(1, N + 1):             # largest divisor of N that fits
        if N % d == 0 and d <= target_nb and fixed + d * per_img <= budget:
            nb = d
    needed = fixed + nb * per_img
    vmem_limit = int(min(max(needed, 32 << 20), budget))

    kern = functools.partial(conv_relu_kernel, kh=kh, kw=kw, Wp=Wp,
                             H_out=H_out, W_out=W_out, L=L, nb=nb)
    out_flat = pl.pallas_call(
        kern,
        out_shape=jax.ShapeDtypeStruct((N, C_out, L_out), out_dtype),
        grid_spec=pltpu.PrefetchScalarGridSpec(
            num_scalar_prefetch=0,
            grid=(N // nb,),
            in_specs=[
                pl.BlockSpec((nb, C_in, Lf), lambda g: (g, 0, 0)),
                pl.BlockSpec((C_out, K), lambda g: (0, 0)),
                pl.BlockSpec((C_out, 1), lambda g: (0, 0)),
            ],
            out_specs=pl.BlockSpec((nb, C_out, L_out), lambda g: (g, 0, 0)),
            scratch_shapes=[pltpu.VMEM((K, nb * L), jnp.bfloat16)],
        ),
        compiler_params=pltpu.CompilerParams(
            dimension_semantics=("parallel",),
            vmem_limit_bytes=vmem_limit),
        cost_estimate=pl.CostEstimate(
            flops=2 * N * C_out * K * L,
            transcendentals=0,
            bytes_accessed=(N * C_in * Lf * 2 + C_out * K * 2 + C_out * 4
                            + N * C_out * L_out * out_bytes)),
    )(x_flat, w2, b2)

    # Crop already happened inside the kernel; this reshape is free (row-major
    # split of the last dim), no transpose, no extra HBM pass.
    return out_flat.reshape(N, C_out, H_out, W_out)


def _reference(x, weight, bias, *, stride=1, padding=1):
    y = jax.lax.conv_general_dilated(
        x, weight,
        window_strides=(stride, stride),
        padding=[(padding, padding), (padding, padding)],
        dimension_numbers=("NCHW", "OIHW", "NCHW"))
    y = y + bias[None, :, None, None]
    return jnp.maximum(y, 0.0)


if __name__ == "__main__":
    key = jax.random.PRNGKey(0)
    k_x, k_w, k_b = jax.random.split(key, 3)

    # Shapes consistent with ConvModule(in_channels=4, out_channels=8,
    # kernel_size=3, stride=1, padding=1, norm_cfg=None, act_cfg=ReLU).
    N, C_in, H, W = 2, 4, 16, 16
    C_out, ksize = 8, 3

    x = jax.random.normal(k_x, (N, C_in, H, W), jnp.float32)
    fan_in = C_in * ksize * ksize
    bound = 1.0 / np.sqrt(fan_in)
    weight = jax.random.uniform(k_w, (C_out, C_in, ksize, ksize),
                                jnp.float32, -bound, bound)
    bias = jax.random.uniform(k_b, (C_out,), jnp.float32, -bound, bound)

    fwd = jax.jit(functools.partial(conv_module_forward, stride=1, padding=1))
    y = fwd(x, weight, bias)
    jax.block_until_ready(y)

    y_ref = _reference(x, weight, bias, stride=1, padding=1)
    # bf16 MXU inputs (f32 accumulation) -> loosened tolerance vs f32 reference.
    if not np.allclose(np.asarray(y), np.asarray(y_ref), atol=5e-2, rtol=5e-2):
        raise AssertionError("Pallas ConvModule output mismatch vs reference")

    print("KERNEL_OK")
</pallas_src>

<mosaic_0001>
module attributes {stable_mosaic.version = 11 : i64} {
  func.func @conv_relu_kernel(%arg0: i32, %arg1: memref<1x4x342xbf16, #tpu.memory_space<vmem>>, %arg2: memref<8x36xbf16, #tpu.memory_space<vmem>>, %arg3: memref<8x1xf32, #tpu.memory_space<vmem>>, %arg4: memref<1x8x256xf32, #tpu.memory_space<vmem>>, %arg5: memref<36x288xbf16, #tpu.memory_space<vmem>>) attributes {dimension_semantics = [#tpu.dimension_semantics<parallel>], iteration_bounds = array<i64: 2>, scalar_prefetch = 0 : i64, scratch_operands = 1 : i64, tpu.core_type = #tpu.core_type<tc>, window_params = [{transform_indices = @transform_0, window_bounds = array<i64: 1, 4, 342>}, {pipeline_mode = #tpu.pipeline_mode<synchronous>, transform_indices = @transform_1, window_bounds = array<i64: 8, 36>}, {pipeline_mode = #tpu.pipeline_mode<synchronous>, transform_indices = @transform_2, window_bounds = array<i64: 8, 1>}, {transform_indices = @transform_3, window_bounds = array<i64: 1, 8, 256>}]} {
    %c0 = arith.constant 0 : index
    %c0_0 = arith.constant 0 : index
    %c0_1 = arith.constant 0 : index
    %0 = vector.load %arg1[%c0, %c0_0, %c0_1] : memref<1x4x342xbf16, #tpu.memory_space<vmem>>, vector<1x4x342xbf16>
    %1 = vector.shape_cast %0 : vector<1x4x342xbf16> to vector<4x342xbf16>
    %2 = vector.extract_strided_slice %1 {offsets = [0, 0], sizes = [4, 288], strides = [1, 1]} : vector<4x342xbf16> to vector<4x288xbf16>
    %c0_2 = arith.constant 0 : index
    %c0_3 = arith.constant 0 : index
    %3 = vector.load %arg5[%c0_2, %c0_3] : memref<36x288xbf16, #tpu.memory_space<vmem>>, vector<4x288xbf16>
    tpu.vector_store %arg5[%c0_2, %c0_3], %2 {strides = array<i32>} : memref<36x288xbf16, #tpu.memory_space<vmem>>, vector<4x288xbf16>,
    %4 = vector.extract_strided_slice %1 {offsets = [0, 1], sizes = [4, 288], strides = [1, 1]} : vector<4x342xbf16> to vector<4x288xbf16>
    %c4 = arith.constant 4 : index
    %c0_4 = arith.constant 0 : index
    %5 = vector.load %arg5[%c4, %c0_4] : memref<36x288xbf16, #tpu.memory_space<vmem>>, vector<4x288xbf16>
    tpu.vector_store %arg5[%c4, %c0_4], %4 {strides = array<i32>} : memref<36x288xbf16, #tpu.memory_space<vmem>>, vector<4x288xbf16>,
    %6 = vector.extract_strided_slice %1 {offsets = [0, 2], sizes = [4, 288], strides = [1, 1]} : vector<4x342xbf16> to vector<4x288xbf16>
    %c8 = arith.constant 8 : index
    %c0_5 = arith.constant 0 : index
    %7 = vector.load %arg5[%c8, %c0_5] : memref<36x288xbf16, #tpu.memory_space<vmem>>, vector<4x288xbf16>
    tpu.vector_store %arg5[%c8, %c0_5], %6 {strides = array<i32>} : memref<36x288xbf16, #tpu.memory_space<vmem>>, vector<4x288xbf16>,
    %8 = vector.extract_strided_slice %1 {offsets = [0, 18], sizes = [4, 288], strides = [1, 1]} : vector<4x342xbf16> to vector<4x288xbf16>
    %c12 = arith.constant 12 : index
    %c0_6 = arith.constant 0 : index
    %9 = vector.load %arg5[%c12, %c0_6] : memref<36x288xbf16, #tpu.memory_space<vmem>>, vector<4x288xbf16>
    tpu.vector_store %arg5[%c12, %c0_6], %8 {strides = array<i32>} : memref<36x288xbf16, #tpu.memory_space<vmem>>, vector<4x288xbf16>,
    %10 = vector.extract_strided_slice %1 {offsets = [0, 19], sizes = [4, 288], strides = [1, 1]} : vector<4x342xbf16> to vector<4x288xbf16>
    %c16 = arith.constant 16 : index
    %c0_7 = arith.constant 0 : index
    %11 = vector.load %arg5[%c16, %c0_7] : memref<36x288xbf16, #tpu.memory_space<vmem>>, vector<4x288xbf16>
    tpu.vector_store %arg5[%c16, %c0_7], %10 {strides = array<i32>} : memref<36x288xbf16, #tpu.memory_space<vmem>>, vector<4x288xbf16>,
    %12 = vector.extract_strided_slice %1 {offsets = [0, 20], sizes = [4, 288], strides = [1, 1]} : vector<4x342xbf16> to vector<4x288xbf16>
    %c20 = arith.constant 20 : index
    %c0_8 = arith.constant 0 : index
    %13 = vector.load %arg5[%c20, %c0_8] : memref<36x288xbf16, #tpu.memory_space<vmem>>, vector<4x288xbf16>
    tpu.vector_store %arg5[%c20, %c0_8], %12 {strides = array<i32>} : memref<36x288xbf16, #tpu.memory_space<vmem>>, vector<4x288xbf16>,
    %14 = vector.extract_strided_slice %1 {offsets = [0, 36], sizes = [4, 288], strides = [1, 1]} : vector<4x342xbf16> to vector<4x288xbf16>
    %c24 = arith.constant 24 : index
    %c0_9 = arith.constant 0 : index
    %15 = vector.load %arg5[%c24, %c0_9] : memref<36x288xbf16, #tpu.memory_space<vmem>>, vector<4x288xbf16>
    tpu.vector_store %arg5[%c24, %c0_9], %14 {strides = array<i32>} : memref<36x288xbf16, #tpu.memory_space<vmem>>, vector<4x288xbf16>,
    %16 = vector.extract_strided_slice %1 {offsets = [0, 37], sizes = [4, 288], strides = [1, 1]} : vector<4x342xbf16> to vector<4x288xbf16>
    %c28 = arith.constant 28 : index
    %c0_10 = arith.constant 0 : index
    %17 = vector.load %arg5[%c28, %c0_10] : memref<36x288xbf16, #tpu.memory_space<vmem>>, vector<4x288xbf16>
    tpu.vector_store %arg5[%c28, %c0_10], %16 {strides = array<i32>} : memref<36x288xbf16, #tpu.memory_space<vmem>>, vector<4x288xbf16>,
    %18 = vector.extract_strided_slice %1 {offsets = [0, 38], sizes = [4, 288], strides = [1, 1]} : vector<4x342xbf16> to vector<4x288xbf16>
    %c32 = arith.constant 32 : index
    %c0_11 = arith.constant 0 : index
    %19 = vector.load %arg5[%c32, %c0_11] : memref<36x288xbf16, #tpu.memory_space<vmem>>, vector<4x288xbf16>
    tpu.vector_store %arg5[%c32, %c0_11], %18 {strides = array<i32>} : memref<36x288xbf16, #tpu.memory_space<vmem>>, vector<4x288xbf16>,
    %c0_12 = arith.constant 0 : index
    %c0_13 = arith.constant 0 : index
    %20 = vector.load %arg2[%c0_12, %c0_13] : memref<8x36xbf16, #tpu.memory_space<vmem>>, vector<8x36xbf16>
    %c0_14 = arith.constant 0 : index
    %c0_15 = arith.constant 0 : index
    %21 = vector.load %arg5[%c0_14, %c0_15] : memref<36x288xbf16, #tpu.memory_space<vmem>>, vector<36x288xbf16>
    %cst = arith.constant dense<0.000000e+00> : vector<8x288xf32>
    %22 = tpu.matmul %20, %21, %cst {dimension_numbers = #tpu.dot_dimension_numbers<[1], [0], [0], [1], [0, 0, 1, 1], [], []>} : vector<8x36xbf16>, vector<36x288xbf16>, vector<8x288xf32> -> vector<8x288xf32>
    %c0_16 = arith.constant 0 : index
    %c0_17 = arith.constant 0 : index
    %23 = vector.load %arg3[%c0_16, %c0_17] : memref<8x1xf32, #tpu.memory_space<vmem>>, vector<8x1xf32>
    %24 = vector.broadcast %23 : vector<8x1xf32> to vector<8x288xf32>
    %25 = arith.addf %22, %24 : vector<8x288xf32>
    %cst_18 = arith.constant 0.000000e+00 : f32
    %26 = vector.broadcast %cst_18 : f32 to vector<8x288xf32>
    %27 = arith.maximumf %25, %26 : vector<8x288xf32>
    %28 = vector.extract_strided_slice %27 {offsets = [0, 0], sizes = [8, 16], strides = [1, 1]} : vector<8x288xf32> to vector<8x16xf32>
    %c0_19 = arith.constant 0 : index
    %c0_20 = arith.constant 0 : index
    %c0_21 = arith.constant 0 : index
    %29 = vector.load %arg4[%c0_19, %c0_20, %c0_21] : memref<1x8x256xf32, #tpu.memory_space<vmem>>, vector<1x8x16xf32>
    %30 = vector.shape_cast %29 : vector<1x8x16xf32> to vector<8x16xf32>
    %31 = vector.shape_cast %28 : vector<8x16xf32> to vector<1x8x16xf32>
    tpu.vector_store %arg4[%c0_19, %c0_20, %c0_21], %31 {strides = array<i32>} : memref<1x8x256xf32, #tpu.memory_space<vmem>>, vector<1x8x16xf32>,
    %32 = vector.extract_strided_slice %27 {offsets = [0, 18], sizes = [8, 16], strides = [1, 1]} : vector<8x288xf32> to vector<8x16xf32>
    %c0_22 = arith.constant 0 : index
    %c0_23 = arith.constant 0 : index
    %c16_24 = arith.constant 16 : index
    %33 = vector.load %arg4[%c0_22, %c0_23, %c16_24] : memref<1x8x256xf32, #tpu.memory_space<vmem>>, vector<1x8x16xf32>
    %34 = vector.shape_cast %33 : vector<1x8x16xf32> to vector<8x16xf32>
    %35 = vector.shape_cast %32 : vector<8x16xf32> to vector<1x8x16xf32>
    tpu.vector_store %arg4[%c0_22, %c0_23, %c16_24], %35 {strides = array<i32>} : memref<1x8x256xf32, #tpu.memory_space<vmem>>, vector<1x8x16xf32>,
    %36 = vector.extract_strided_slice %27 {offsets = [0, 36], sizes = [8, 16], strides = [1, 1]} : vector<8x288xf32> to vector<8x16xf32>
    %c0_25 = arith.constant 0 : index
    %c0_26 = arith.constant 0 : index
    %c32_27 = arith.constant 32 : index
    %37 = vector.load %arg4[%c0_25, %c0_26, %c32_27] : memref<1x8x256xf32, #tpu.memory_space<vmem>>, vector<1x8x16xf32>
    %38 = vector.shape_cast %37 : vector<1x8x16xf32> to vector<8x16xf32>
    %39 = vector.shape_cast %36 : vector<8x16xf32> to vector<1x8x16xf32>
    tpu.vector_store %arg4[%c0_25, %c0_26, %c32_27], %39 {strides = array<i32>} : memref<1x8x256xf32, #tpu.memory_space<vmem>>, vector<1x8x16xf32>,
    %40 = vector.extract_strided_slice %27 {offsets = [0, 54], sizes = [8, 16], strides = [1, 1]} : vector<8x288xf32> to vector<8x16xf32>
    %c0_28 = arith.constant 0 : index
    %c0_29 = arith.constant 0 : index
    %c48 = arith.constant 48 : index
    %41 = vector.load %arg4[%c0_28, %c0_29, %c48] : memref<1x8x256xf32, #tpu.memory_space<vmem>>, vector<1x8x16xf32>
    %42 = vector.shape_cast %41 : vector<1x8x16xf32> to vector<8x16xf32>
    %43 = vector.shape_cast %40 : vector<8x16xf32> to vector<1x8x16xf32>
    tpu.vector_store %arg4[%c0_28, %c0_29, %c48], %43 {strides = array<i32>} : memref<1x8x256xf32, #tpu.memory_space<vmem>>, vector<1x8x16xf32>,
    %44 = vector.extract_strided_slice %27 {offsets = [0, 72], sizes = [8, 16], strides = [1, 1]} : vector<8x288xf32> to vector<8x16xf32>
    %c0_30 = arith.constant 0 : index
    %c0_31 = arith.constant 0 : index
    %c64 = arith.constant 64 : index
    %45 = vector.load %arg4[%c0_30, %c0_31, %c64] : memref<1x8x256xf32, #tpu.memory_space<vmem>>, vector<1x8x16xf32>
    %46 = vector.shape_cast %45 : vector<1x8x16xf32> to vector<8x16xf32>
    %47 = vector.shape_cast %44 : vector<8x16xf32> to vector<1x8x16xf32>
    tpu.vector_store %arg4[%c0_30, %c0_31, %c64], %47 {strides = array<i32>} : memref<1x8x256xf32, #tpu.memory_space<vmem>>, vector<1x8x16xf32>,
    %48 = vector.extract_strided_slice %27 {offsets = [0, 90], sizes = [8, 16], strides = [1, 1]} : vector<8x288xf32> to vector<8x16xf32>
    %c0_32 = arith.constant 0 : index
    %c0_33 = arith.constant 0 : index
    %c80 = arith.constant 80 : index
    %49 = vector.load %arg4[%c0_32, %c0_33, %c80] : memref<1x8x256xf32, #tpu.memory_space<vmem>>, vector<1x8x16xf32>
    %50 = vector.shape_cast %49 : vector<1x8x16xf32> to vector<8x16xf32>
    %51 = vector.shape_cast %48 : vector<8x16xf32> to vector<1x8x16xf32>
    tpu.vector_store %arg4[%c0_32, %c0_33, %c80], %51 {strides = array<i32>} : memref<1x8x256xf32, #tpu.memory_space<vmem>>, vector<1x8x16xf32>,
    %52 = vector.extract_strided_slice %27 {offsets = [0, 108], sizes = [8, 16], strides = [1, 1]} : vector<8x288xf32> to vector<8x16xf32>
    %c0_34 = arith.constant 0 : index
    %c0_35 = arith.constant 0 : index
    %c96 = arith.constant 96 : index
    %53 = vector.load %arg4[%c0_34, %c0_35, %c96] : memref<1x8x256xf32, #tpu.memory_space<vmem>>, vector<1x8x16xf32>
    %54 = vector.shape_cast %53 : vector<1x8x16xf32> to vector<8x16xf32>
    %55 = vector.shape_cast %52 : vector<8x16xf32> to vector<1x8x16xf32>
    tpu.vector_store %arg4[%c0_34, %c0_35, %c96], %55 {strides = array<i32>} : memref<1x8x256xf32, #tpu.memory_space<vmem>>, vector<1x8x16xf32>,
    %56 = vector.extract_strided_slice %27 {offsets = [0, 126], sizes = [8, 16], strides = [1, 1]} : vector<8x288xf32> to vector<8x16xf32>
    %c0_36 = arith.constant 0 : index
    %c0_37 = arith.constant 0 : index
    %c112 = arith.constant 112 : index
    %57 = vector.load %arg4[%c0_36, %c0_37, %c112] : memref<1x8x256xf32, #tpu.memory_space<vmem>>, vector<1x8x16xf32>
    %58 = vector.shape_cast %57 : vector<1x8x16xf32> to vector<8x16xf32>
    %59 = vector.shape_cast %56 : vector<8x16xf32> to vector<1x8x16xf32>
    tpu.vector_store %arg4[%c0_36, %c0_37, %c112], %59 {strides = array<i32>} : memref<1x8x256xf32, #tpu.memory_space<vmem>>, vector<1x8x16xf32>,
    %60 = vector.extract_strided_slice %27 {offsets = [0, 144], sizes = [8, 16], strides = [1, 1]} : vector<8x288xf32> to vector<8x16xf32>
    %c0_38 = arith.constant 0 : index
    %c0_39 = arith.constant 0 : index
    %c128 = arith.constant 128 : index
    %61 = vector.load %arg4[%c0_38, %c0_39, %c128] : memref<1x8x256xf32, #tpu.memory_space<vmem>>, vector<1x8x16xf32>
    %62 = vector.shape_cast %61 : vector<1x8x16xf32> to vector<8x16xf32>
    %63 = vector.shape_cast %60 : vector<8x16xf32> to vector<1x8x16xf32>
    tpu.vector_store %arg4[%c0_38, %c0_39, %c128], %63 {strides = array<i32>} : memref<1x8x256xf32, #tpu.memory_space<vmem>>, vector<1x8x16xf32>,
    %64 = vector.extract_strided_slice %27 {offsets = [0, 162], sizes = [8, 16], strides = [1, 1]} : vector<8x288xf32> to vector<8x16xf32>
    %c0_40 = arith.constant 0 : index
    %c0_41 = arith.constant 0 : index
    %c144 = arith.constant 144 : index
    %65 = vector.load %arg4[%c0_40, %c0_41, %c144] : memref<1x8x256xf32, #tpu.memory_space<vmem>>, vector<1x8x16xf32>
    %66 = vector.shape_cast %65 : vector<1x8x16xf32> to vector<8x16xf32>
    %67 = vector.shape_cast %64 : vector<8x16xf32> to vector<1x8x16xf32>
    tpu.vector_store %arg4[%c0_40, %c0_41, %c144], %67 {strides = array<i32>} : memref<1x8x256xf32, #tpu.memory_space<vmem>>, vector<1x8x16xf32>,
    %68 = vector.extract_strided_slice %27 {offsets = [0, 180], sizes = [8, 16], strides = [1, 1]} : vector<8x288xf32> to vector<8x16xf32>
    %c0_42 = arith.constant 0 : index
    %c0_43 = arith.constant 0 : index
    %c160 = arith.constant 160 : index
    %69 = vector.load %arg4[%c0_42, %c0_43, %c160] : memref<1x8x256xf32, #tpu.memory_space<vmem>>, vector<1x8x16xf32>
    %70 = vector.shape_cast %69 : vector<1x8x16xf32> to vector<8x16xf32>
    %71 = vector.shape_cast %68 : vector<8x16xf32> to vector<1x8x16xf32>
    tpu.vector_store %arg4[%c0_42, %c0_43, %c160], %71 {strides = array<i32>} : memref<1x8x256xf32, #tpu.memory_space<vmem>>, vector<1x8x16xf32>,
    %72 = vector.extract_strided_slice %27 {offsets = [0, 198], sizes = [8, 16], strides = [1, 1]} : vector<8x288xf32> to vector<8x16xf32>
    %c0_44 = arith.constant 0 : index
    %c0_45 = arith.constant 0 : index
    %c176 = arith.constant 176 : index
    %73 = vector.load %arg4[%c0_44, %c0_45, %c176] : memref<1x8x256xf32, #tpu.memory_space<vmem>>, vector<1x8x16xf32>
    %74 = vector.shape_cast %73 : vector<1x8x16xf32> to vector<8x16xf32>
    %75 = vector.shape_cast %72 : vector<8x16xf32> to vector<1x8x16xf32>
    tpu.vector_store %arg4[%c0_44, %c0_45, %c176], %75 {strides = array<i32>} : memref<1x8x256xf32, #tpu.memory_space<vmem>>, vector<1x8x16xf32>,
    %76 = vector.extract_strided_slice %27 {offsets = [0, 216], sizes = [8, 16], strides = [1, 1]} : vector<8x288xf32> to vector<8x16xf32>
    %c0_46 = arith.constant 0 : index
    %c0_47 = arith.constant 0 : index
    %c192 = arith.constant 192 : index
    %77 = vector.load %arg4[%c0_46, %c0_47, %c192] : memref<1x8x256xf32, #tpu.memory_space<vmem>>, vector<1x8x16xf32>
    %78 = vector.shape_cast %77 : vector<1x8x16xf32> to vector<8x16xf32>
    %79 = vector.shape_cast %76 : vector<8x16xf32> to vector<1x8x16xf32>
    tpu.vector_store %arg4[%c0_46, %c0_47, %c192], %79 {strides = array<i32>} : memref<1x8x256xf32, #tpu.memory_space<vmem>>, vector<1x8x16xf32>,
    %80 = vector.extract_strided_slice %27 {offsets = [0, 234], sizes = [8, 16], strides = [1, 1]} : vector<8x288xf32> to vector<8x16xf32>
    %c0_48 = arith.constant 0 : index
    %c0_49 = arith.constant 0 : index
    %c208 = arith.constant 208 : index
    %81 = vector.load %arg4[%c0_48, %c0_49, %c208] : memref<1x8x256xf32, #tpu.memory_space<vmem>>, vector<1x8x16xf32>
    %82 = vector.shape_cast %81 : vector<1x8x16xf32> to vector<8x16xf32>
    %83 = vector.shape_cast %80 : vector<8x16xf32> to vector<1x8x16xf32>
    tpu.vector_store %arg4[%c0_48, %c0_49, %c208], %83 {strides = array<i32>} : memref<1x8x256xf32, #tpu.memory_space<vmem>>, vector<1x8x16xf32>,
    %84 = vector.extract_strided_slice %27 {offsets = [0, 252], sizes = [8, 16], strides = [1, 1]} : vector<8x288xf32> to vector<8x16xf32>
    %c0_50 = arith.constant 0 : index
    %c0_51 = arith.constant 0 : index
    %c224 = arith.constant 224 : index
    %85 = vector.load %arg4[%c0_50, %c0_51, %c224] : memref<1x8x256xf32, #tpu.memory_space<vmem>>, vector<1x8x16xf32>
    %86 = vector.shape_cast %85 : vector<1x8x16xf32> to vector<8x16xf32>
    %87 = vector.shape_cast %84 : vector<8x16xf32> to vector<1x8x16xf32>
    tpu.vector_store %arg4[%c0_50, %c0_51, %c224], %87 {strides = array<i32>} : memref<1x8x256xf32, #tpu.memory_space<vmem>>, vector<1x8x16xf32>,
    %88 = vector.extract_strided_slice %27 {offsets = [0, 270], sizes = [8, 16], strides = [1, 1]} : vector<8x288xf32> to vector<8x16xf32>
    %c0_52 = arith.constant 0 : index
    %c0_53 = arith.constant 0 : index
    %c240 = arith.constant 240 : index
    %89 = vector.load %arg4[%c0_52, %c0_53, %c240] : memref<1x8x256xf32, #tpu.memory_space<vmem>>, vector<1x8x16xf32>
    %90 = vector.shape_cast %89 : vector<1x8x16xf32> to vector<8x16xf32>
    %91 = vector.shape_cast %88 : vector<8x16xf32> to vector<1x8x16xf32>
    tpu.vector_store %arg4[%c0_52, %c0_53, %c240], %91 {strides = array<i32>} : memref<1x8x256xf32, #tpu.memory_space<vmem>>, vector<1x8x16xf32>,
    return
  }
  func.func @transform_0(%arg0: i32) -> (i32, i32, i32) {
    %c0_i32 = arith.constant 0 : i32
    %c0_i32_0 = arith.constant 0 : i32
    %c0_i32_1 = arith.constant 0 : i32
    return %arg0, %c0_i32, %c0_i32_0 : i32, i32, i32
  }
  func.func @transform_1(%arg0: i32) -> (i32, i32) {
    %c0_i32 = arith.constant 0 : i32
    %c0_i32_0 = arith.constant 0 : i32
    %c0_i32_1 = arith.constant 0 : i32
    return %c0_i32, %c0_i32_0 : i32, i32
  }
  func.func @transform_2(%arg0: i32) -> (i32, i32) {
    %c0_i32 = arith.constant 0 : i32
    %c0_i32_0 = arith.constant 0 : i32
    %c0_i32_1 = arith.constant 0 : i32
    return %c0_i32, %c0_i32_0 : i32, i32
  }
  func.func @transform_3(%arg0: i32) -> (i32, i32, i32) {
    %c0_i32 = arith.constant 0 : i32
    %c0_i32_0 = arith.constant 0 : i32
    %c0_i32_1 = arith.constant 0 : i32
    return %arg0, %c0_i32, %c0_i32_0 : i32, i32, i32
  }
}

</mosaic_0001>

<bundles_post_ra>
// kernel: conv_module_forward.1
= control target key start
LH: loop header
LB: loop body
LE: loop exit
PB: predicated region body
PF: predicated region fallthrough
CT: control target
= control target key end

     0   :  { %s705_s12 = smov 0   ;;  %s781_s0 = inlined_call_operand.vmem [shape: bf16[2,4,342], index: 0, kind: input, shape index: {}]   ;;  %s782_s1 = inlined_call_operand.vmem [shape: bf16[8,36], index: 1, kind: input, shape index: {}]   ;;  %s783_s2 = inlined_call_operand.vmem [shape: f32[8,1], index: 2, kind: input, shape index: {}]   ;;  %s784_s3 = inlined_call_operand.vmem [shape: f32[2,8,256], index: 3, kind: output, shape index: {}]  }
   0x1 LB: > { %s580_s13 = sadd.s32 4294967295, %s662_s12   ;;  %p584_p0 = scmp.ge.s32.totalorder %s662_s12, 1  ;;  %s662_s12 = sphi %s705_s12, %s13_s12  }
   0x2   : > { %p137_p1 = scmp.lt.s32.totalorder %s662_s12, 3 }
   0x4   : > { %p138_p2 = pnand %p584_p0, %p137_p1 }
   0x5   : > { %p161_p3 = scmp.lt.s32.totalorder (!%p138_p2), %s580_s13, 1  ;;  %s664_s18 = smov (!%p138_p2), 127  }
   0x6   : > { %141 = sbr.rel (%p138_p2) target bundleno = 530 (0x212), region = 32  ;;  %s665_s19 = smov (!%p138_p2), 109  }
   0x7   : > { %s666_s20 = smov (!%p138_p2), 108   ;;  %s667_s21 = smov (!%p138_p2), 92  }
   0x8   : > { %s668_s22 = smov (!%p138_p2), 91   ;;  %s669_s23 = smov (!%p138_p2), 126  }
   0x9   : > { %s670_s24 = smov (!%p138_p2), 90   ;;  %s671_s25 = smov (!%p138_p2), 110  }
   0xa   : > { %s673_s7 = smov (!%p138_p2), 124   ;;  %s674_s8 = smov (!%p138_p2), 112  }
   0xb   : > { %s786_s13 = smov (!%p161_p3, %s580_s13), 1  ;;  %vm201_vm0 = vcmask 257026   ;;  %vm180_vm1 = vcmask 254976   ;;  %vm196_vm2 = vcmask 1039360   ;;  %vm194_vm3 = vcmask 1043456   ;;  %v343_v54 = vld [vmem:[%s783_s2] sm:$0xff] }
   0xc   : > { %s624_s14 = smul.u32 6, %s786_s13  ;;  %vm271_vm4 = vcmask 883712   ;;  %vm252_vm5 = vcmask 891904   ;;  %vm289_vm6 = vcmask 752640   ;;  %vm308_vm7 = vcmask 744448   ;;  %s617_s30 = sshll.u32 %s786_s13, 4 }
   0xd   : > { %vm326_vm8 = vcmask 736256   ;;  %v672_v56 = vmov 0   ;;  %vm215_vm9 = vcmask 1031168   ;;  %vm393_vm10 = vcmask 1041408   ;;  %s755_s6 = scalar_lea.vmem %s784_s3, %s617_s30  ;;  %s675_s9 = smov 122  }
   0xe   : > { %s165_s17 = scalar_lea.vmem %s781_s0, %s624_s14  ;;  %654 = vset.pattern.permute.xlu1 %v672_v56  ;;  %655 = vset.pattern.permute.xlu0 %v672_v56  ;;  %vm234_vm11 = vcmask 900096   ;;  %vm389_vm12 = vcmask 293888   ;;  %vm445_vm13 = vcmask 130048   ;;  %s676_s10 = smov 120   ;;  %vm451_vm14 = vcmask 261248  }
   0xf   : > { %v172_v0 = vld [vmem:[%s165_s17] sm:$0x3f]  ;;  %s677_s11 = smov 106   ;;  %s678_s13 = smov 104   ;;  %vm456_vm15 = vcmask 392448  }
  0x10   : > { %174 = vst [vmem:[#allocation1] ss:$2 sm:$0xff] %v172_v0  ;;  %s679_s14 = smov 102   ;;  %s680_s15 = smov 118  }
  0x11   : > { %s681_s16 = smov 100   ;;  %s682_s17 = smov 116  }
  0x17   : > { %v175_v1 = vld.sshfl [vmem:[#allocation1] sm:$0xff pattern:$0x75643120]  ;;  %v176_v2 = vld.sshfl [vmem:[#allocation1 + $0x8] sm:$0xff pattern:$0x75643120] }
  0x18   : > { %183 = vst [vmem:[#allocation1 + $0x1] ss:$2 sm:$0xff] %v172_v0 }
  0x19   : > { %179 = vst [vmem:[#allocation2] sm:$0x33] %v175_v1 }
  0x1a   : > { %181 = vst.msk [vmem:[#allocation2 + $0x8] sm:$0x3] %vm180_vm1, %v176_v2 }
  0x1f   : > { %v184_v3 = vld.sshfl [vmem:[#allocation1] sm:$0xff pattern:$0x75643120]  ;;  %v186_v4 = vld.sshfl [vmem:[#allocation1 + $0x8] sm:$0xff pattern:$0x75643120] }
  0x20   : > { %188 = vrot.lane.b32.xlu1 %v184_v3, %s664_s18  ;;  %203 = vst [vmem:[#allocation1] ss:$2 sm:$0xff] %v172_v0  ;;  %190 = vrot.lane.b32.xlu2 %v186_v4, %s664_s18  ;;  %s683_s18 = smov 114  }
  0x27   : > { %v204_v5 = vld.sshfl [vmem:[#allocation1] sm:$0xff pattern:$0x75643120]  ;;  %v206_v6 = vld.sshfl [vmem:[#allocation1 + $0x8] sm:$0xff pattern:$0x75643120] }
  0x28   : > { %222 = vst [vmem:[#allocation1 + $0x1] ss:$2 sm:$0xff] %v172_v0 }
  0x2f   : > { %v223_v7 = vld.sshfl [vmem:[#allocation1] sm:$0xff pattern:$0x75643120]  ;;  %v225_v8 = vld.sshfl [vmem:[#allocation1 + $0x8] sm:$0xff pattern:$0x75643120] }
  0x30   : > { %240 = vst [vmem:[#allocation1] ss:$2 sm:$0xff] %v172_v0 }
  0x37   : > { %v241_v9 = vld.sshfl [vmem:[#allocation1] sm:$0xff pattern:$0x75643120]  ;;  %v243_v10 = vld.sshfl [vmem:[#allocation1 + $0x8] sm:$0xff pattern:$0x75643120] }
  0x38   : > { %245 = vrot.lane.b32.xlu1 %v241_v9, %s665_s19  ;;  %259 = vst [vmem:[#allocation1 + $0x1] ss:$2 sm:$0xff] %v172_v0 }
  0x3f   : > { %v260_v11 = vld.sshfl [vmem:[#allocation1] sm:$0xff pattern:$0x75643120]  ;;  %v262_v12 = vld.sshfl [vmem:[#allocation1 + $0x8] sm:$0xff pattern:$0x75643120] }
  0x40   : > { %247 = vrot.lane.b32.xlu1 %v243_v10, %s665_s19  ;;  %277 = vst [vmem:[#allocation1] ss:$2 sm:$0xff] %v172_v0  ;;  %264 = vrot.lane.b32.xlu2 %v260_v11, %s666_s20  ;;  %s684_s19 = smov 98  }
  0x47   : > { %v280_v13 = vld.sshfl [vmem:[#allocation1 + $0x8] sm:$0xff pattern:$0x75643120]  ;;  %v278_v14 = vld.sshfl [vmem:[#allocation1] sm:$0xff pattern:$0x75643120] }
  0x48   : > { %284 = vrot.lane.b32.xlu1 %v280_v13, %s667_s21  ;;  %282 = vrot.lane.b32.xlu0 %v278_v14, %s667_s21  ;;  %296 = vst [vmem:[#allocation1 + $0x1] ss:$2 sm:$0xff] %v172_v0 }
  0x49   : > { %266 = vrot.lane.b32.xlu2 %v262_v12, %s666_s20 }
  0x4f   : > { %v299_v15 = vld.sshfl [vmem:[#allocation1 + $0x8] sm:$0xff pattern:$0x75643120]  ;;  %v297_v16 = vld.sshfl [vmem:[#allocation1] sm:$0xff pattern:$0x75643120] }
  0x50   : > { %303 = vrot.lane.b32.xlu0 %v299_v15, %s668_s22  ;;  %314 = vst [vmem:[#allocation1] ss:$2 sm:$0xff] %v172_v0  ;;  %210 = vrot.lane.b32.xlu1 %v206_v6, %s669_s23 }
  0x51   : > { %301 = vrot.lane.b32.xlu2 %v297_v16, %s668_s22 }
  0x57   : > { %v315_v17 = vld.sshfl [vmem:[#allocation1] sm:$0xff pattern:$0x75643120]  ;;  %v317_v18 = vld.sshfl [vmem:[#allocation1 + $0x8] sm:$0xff pattern:$0x75643120] }
  0x58   : > { %319 = vrot.lane.b32.xlu0 %v315_v17, %s670_s24  ;;  %346 = vperm.xlu1 %654, %v343_v54  }
  0x59   : > { %227 = vrot.lane.b32.xlu2 %v223_v7, %s671_s25 }
  0x60   : > { %321 = vrot.lane.b32.xlu0 %v317_v18, %s670_s24 }
  0x68   : > { %208 = vrot.lane.b32.xlu0 %v204_v5, %s669_s23 }
  0x70   : > { %229 = vrot.lane.b32.xlu0 %v225_v8, %s671_s25 }
  0x7a   : > { %v191_v19 = vpop.permute.xlu2 %190 }
  0x7b   : > { %202 = vst.msk [vmem:[#allocation2 + $0x8] sm:$0xc] %vm201_vm0, %v191_v19  ;;  %v193_v20 = vrot.slane %v191_v19, 4 }
  0x92   : > { %v189_v21 = vpop.permute.xlu1 %188 }
  0x93   : > { %v192_v22 = vrot.slane %v189_v21, 4 }
  0x95   : > { %v195_v23 = vsel %vm194_vm3, %v192_v22, %v193_v20 }
  0x96   : > { %v197_v24 = vsel %vm196_vm2, %v189_v21, %v195_v23  ;;  %vm471_vm2 = vcmask 786048  }
  0x97   : > { %200 = vst [vmem:[#allocation2] sm:$0xcc] %v197_v24 }
  0x9a   : > { %v265_v25 = vpop.permute.xlu2 %264 }
  0x9b   : > { %v268_v26 = vrot.slane %v265_v25, 4 }
  0xa3   : > { %v267_v27 = vpop.permute.xlu2 %266 }
  0xa4   : > { %v269_v28 = vrot.slane %v267_v27, 4  ;;  %276 = vst.msk [vmem:[#allocation2 + $0x20] sm:$0xc] %vm201_vm0, %v267_v27 }
  0xa6   : > { %v270_v29 = vsel %vm194_vm3, %v268_v26, %v269_v28  ;;  %v332_v28 = vld [vmem:[%s782_s1] sm:$0xf] }
  0xa7   : > { %v272_v30 = vsel %vm271_vm4, %v265_v25, %v270_v29  ;;  %v598_v25 = vld [vmem:[#allocation2 + $0x8] sm:$0xf]  ;;  %v590_v29 = vld [vmem:[#allocation2] sm:$0xf]  ;;  %vm476_vm4 = vcmask 917248  }
  0xa8   : > { %275 = vst [vmem:[#allocation2 + $0x18] sm:$0xcc] %v272_v30 }
  0xaa   : > { %v246_v31 = vpop.permute.xlu1 %245 }
  0xab   : > { %v249_v32 = vrot.slane %v246_v31, 4  ;;  %v302_v43 = vpop.permute.xlu2 %301 }
  0xac   : > { %v305_v44 = vrot.slane %v302_v43, 4 }
  0xb2   : > { %v248_v33 = vpop.permute.xlu1 %247 }
  0xb3   : > { %v250_v34 = vrot.slane %v248_v33, 4  ;;  %257 = vst.msk [vmem:[#allocation2 + $0x20] sm:$0x3] %vm180_vm1, %v248_v33  ;;  %v228_v2 = vpop.permute.xlu2 %227 }
  0xb4   : > { %v231_v9 = vrot.slane %v228_v2, 4 }
  0xb5   : > { %v251_v35 = vsel %vm194_vm3, %v249_v32, %v250_v34 }
  0xb6   : > { %v253_v36 = vsel %vm252_vm5, %v246_v31, %v251_v35  ;;  %v618_v31 = vld [vmem:[#allocation2 + $0x4] sm:$0xf]  ;;  %vm483_vm5 = vcmask 932864  }
  0xb7   : > { %256 = vst [vmem:[#allocation2 + $0x18] sm:$0x33] %v253_v36 }
  0xba   : > { %v285_v37 = vpop.permute.xlu1 %284  ;;  %v283_v38 = vpop.permute.xlu0 %282  ;;  %v610_v7 = vld [vmem:[#allocation2 + $0x20] sm:$0xf] }
  0xbb   : > { %v287_v39 = vrot.slane %v285_v37, 4  ;;  %294 = vst.msk [vmem:[#allocation2 + $0x2c] sm:$0x3] %vm180_vm1, %v285_v37  ;;  %v286_v40 = vrot.slane %v283_v38, 4 }
  0xbd   : > { %v288_v41 = vsel %vm194_vm3, %v286_v40, %v287_v39 }
  0xbe   : > { %v290_v42 = vsel %vm289_vm6, %v283_v38, %v288_v41  ;;  %v602_v12 = vld [vmem:[#allocation2 + $0x18] sm:$0xf]  ;;  %v621_v13 = vld [vmem:[#allocation2 + $0x1c] sm:$0xf]  ;;  %vm486_vm6 = vcmask 1048448  }
  0xbf   : > { %293 = vst [vmem:[#allocation2 + $0x24] sm:$0x33] %v290_v42 }
  0xc2   : > { %v304_v45 = vpop.permute.xlu0 %303  ;;  %v211_v47 = vpop.permute.xlu1 %210 }
  0xc3   : > { %v306_v46 = vrot.slane %v304_v45, 4  ;;  %313 = vst.msk [vmem:[#allocation2 + $0x2c] sm:$0xc] %vm201_vm0, %v304_v45  ;;  %v213_v58 = vrot.slane %v211_v47, 4 }
  0xc4   : > { %220 = vst.msk [vmem:[#allocation2 + $0x14] sm:$0x3] %vm180_vm1, %v211_v47 }
  0xc5   : > { %v307_v48 = vsel %vm194_vm3, %v305_v44, %v306_v46 }
  0xc6   : > { %v309_v49 = vsel %vm308_vm7, %v302_v43, %v307_v48 }
  0xc7   : > { %312 = vst [vmem:[#allocation2 + $0x24] sm:$0xcc] %v309_v49 }
  0xca   : > { %v320_v50 = vpop.permute.xlu0 %319  ;;  %v623_v8 = vld [vmem:[#allocation2 + $0x28] sm:$0xf0]  ;;  %v347_v35 = vpop.permute.xlu1 %346 }
  0xcb   : > { %v323_v52 = vrot.slane %v320_v50, 4  ;;  %v611_v20 = vor.u32 %v623_v8, %v610_v7 }
  0xce   : > { %v622_v15 = vld [vmem:[#allocation2 + $0x20] sm:$0xf0]  ;;  %v604_v16 = vld [vmem:[#allocation2 + $0x24] sm:$0xf0] }
  0xcf   : > { %v603_v23 = vor.u32 %v622_v15, %v602_v12  ;;  %v607_v24 = vor.u32 %v621_v13, %v604_v16 }
  0xd2   : > { %v322_v51 = vpop.permute.xlu0 %321 }
  0xd3   : > { %v324_v53 = vrot.slane %v322_v51, 4  ;;  %331 = vst.msk [vmem:[#allocation2 + $0x38] sm:$0x3] %vm180_vm1, %v322_v51  ;;  %vm466_vm1 = vcmask 654848  }
  0xd5   : > { %v325_v55 = vsel %vm194_vm3, %v323_v52, %v324_v53 }
  0xd6   : > { %v327_v57 = vsel %vm326_vm8, %v320_v50, %v325_v55 }
  0xd7   : > { %330 = vst [vmem:[#allocation2 + $0x30] sm:$0x33] %v327_v57 }
  0xda   : > { %v209_v59 = vpop.permute.xlu0 %208  ;;  %v342_v60 = vld [vmem:[#allocation2 + $0x38] sm:$0x3] }
  0xdb   : > { %v212_v61 = vrot.slane %v209_v59, 4  ;;  %v373_v62 = vunpack.c.l.b16 %v342_v60 }
  0xdd   : > { %v214_v63 = vsel %vm194_vm3, %v212_v61, %v213_v58  ;;  %v382_v0 = vpack.c.b16 %v373_v62, %v373_v62 }
  0xde   : > { %v216_v1 = vsel %vm215_vm9, %v209_v59, %v214_v63  ;;  %v341_v3 = vld [vmem:[#allocation2 + $0x30] sm:$0x33] }
  0xdf   : > { %219 = vst [vmem:[#allocation2 + $0xc] sm:$0x33] %v216_v1  ;;  %v401_v4 = vsel %vm393_vm10, %v382_v0, 0  ;;  %v371_v5 = vunpack.c.l.b16 %v341_v3  ;;  %v372_v6 = vunpack.c.h.b16 %v341_v3 }
  0xe0   : > { %434 = vmatpush.bf16.msra.mxu2 %v401_v4 }
  0xe1   : > { %v380_v10 = vpack.c.b16 %v371_v5, %v371_v5  ;;  %v381_v11 = vpack.c.b16 %v372_v6, %v372_v6 }
  0xe2   : > { %v230_v14 = vpop.permute.xlu0 %229 }
  0xe3   : > { %v232_v17 = vrot.slane %v230_v14, 4  ;;  %239 = vst.msk [vmem:[#allocation2 + $0x14] sm:$0xc] %vm201_vm0, %v230_v14  ;;  %v395_v18 = vsel %vm393_vm10, %v380_v10, 0  ;;  %v398_v19 = vsel %vm393_vm10, %v381_v11, 0  ;;  %vm461_vm0 = vcmask 523648  }
  0xe4   : > { %408 = vmatpush.bf16.msra.mxu0 %v395_v18  ;;  %421 = vmatpush.bf16.msra.mxu1 %v398_v19 }
  0xe5   : > { %v233_v21 = vsel %vm194_vm3, %v231_v9, %v232_v17  ;;  %435 = vmatpush.bf16.msra.mxu2 %v611_v20  ;;  %vm517_vm3 = vcmask 818176  }
  0xe6   : > { %v235_v22 = vsel %vm234_vm11, %v228_v2, %v233_v21 }
  0xe7   : > { %238 = vst [vmem:[#allocation2 + $0xc] sm:$0xcc] %v235_v22 }
  0xe8   : > { %409 = vmatpush.bf16.msra.mxu0 %v603_v23  ;;  %422 = vmatpush.bf16.msra.mxu1 %v607_v24 }
  0xea   : > { %v620_v26 = vld [vmem:[#allocation2 + $0x10] sm:$0xf0] }
  0xeb   : > { %v599_v27 = vor.u32 %v620_v26, %v598_v25 }
  0xed   : > { %436 = vmatpush.bf16.msra.mxu2 %v599_v27 }
  0xee   : > { %v619_v30 = vld [vmem:[#allocation2 + $0x8] sm:$0xf0]  ;;  %v592_v32 = vld [vmem:[#allocation2 + $0xc] sm:$0xf0] }
  0xef   : > { %v591_v33 = vor.u32 %v619_v30, %v590_v29  ;;  %v595_v34 = vor.u32 %v618_v31, %v592_v32 }
  0xf0   : > { %614 = vmatmul.msk.bf16.vlgmr.msra.gmra.mxu2 %vm389_vm12, %v332_v28 }
  0xf1   : > { %410 = vmatpush.bf16.msra.mxu0 %v591_v33  ;;  %423 = vmatpush.bf16.msra.mxu1 %v595_v34 }
  0xf4   : > { %612 = vmatmul.msk.bf16.vlgmr.msra.gmra.mxu0 %vm389_vm12, %v332_v28  ;;  %613 = vmatmul.msk.bf16.vlgmr.msra.gmra.mxu1 %vm389_vm12, %v332_v28 }
 0x171   : > { %v412_v36 = vpop.f32.mrf.mxu0  ;;  %v425_v37 = vpop.f32.mrf.mxu1 }
 0x172   : > { %v413_v38 = vadd.f32 %v412_v36, %v347_v35  ;;  %v426_v39 = vadd.f32 %v425_v37, %v347_v35 }
 0x173   : > { %v438_v40 = vpop.f32.mrf.mxu2 }
 0x174   : > { %v442_v41 = vmax.f32 %v413_v38, 0.0  ;;  %v443_v42 = vmax.f32 %v426_v39, 0.0  ;;  %v439_v46 = vadd.f32 %v438_v40, %v347_v35 }
 0x176   : > { %453 = vrot.lane.b32.xlu0 %v442_v41, %s673_s7  ;;  %448 = vrot.lane.b32.xlu2 %v442_v41, %s669_s23  ;;  %446 = vst.msk [vmem:[%s755_s6] sm:$0xff] %vm445_vm13, %v442_v41  ;;  %v444_v47 = vmax.f32 %v439_v46, 0.0 }
 0x177   : > { %488 = vrot.lane.b32.xlu1 %v443_v42, %s674_s8 }
 0x179   : > { %v414_v43 = vpop.f32.mrf.mxu0  ;;  %v427_v44 = vpop.f32.mrf.mxu1 }
 0x17b   : > { %v440_v45 = vpop.f32.mrf.mxu2 }
 0x17e   : > { %496 = vrot.lane.b32.xlu0 %v443_v42, %s666_s20  ;;  %492 = vrot.lane.b32.xlu2 %v443_v42, %s671_s25 }
 0x17f   : > { %458 = vrot.lane.b32.xlu1 %v442_v41, %s675_s9 }
 0x186   : > { %463 = vrot.lane.b32.xlu0 %v442_v41, %s676_s10  ;;  %500 = vrot.lane.b32.xlu2 %v443_v42, %s677_s11 }
 0x187   : > { %504 = vrot.lane.b32.xlu1 %v443_v42, %s678_s13 }
 0x18e   : > { %508 = vrot.lane.b32.xlu0 %v443_v42, %s679_s14  ;;  %468 = vrot.lane.b32.xlu2 %v442_v41, %s680_s15 }
 0x18f   : > { %513 = vrot.lane.b32.xlu1 %v443_v42, %s681_s16 }
 0x196   : > { %473 = vrot.lane.b32.xlu0 %v442_v41, %s682_s17  ;;  %515 = vrot.lane.b32.xlu2 %v444_v47, %s681_s16 }
 0x197   : > { %479 = vrot.lane.b32.xlu1 %v442_v41, %s683_s18 }
 0x19e   : > { %521 = vrot.lane.b32.xlu0 %v444_v47, %s684_s19  ;;  %481 = vrot.lane.b32.xlu2 %v443_v42, %s683_s18 }
 0x1d0   : > { %v449_v48 = vpop.permute.xlu2 %448 }
 0x1d1   : > { %452 = vst.msk [vmem:[%s755_s6] sm:$0xff] %vm451_vm14, %v449_v48 }
 0x1d8   : > { %v493_v49 = vpop.permute.xlu2 %492 }
 0x1e0   : > { %v501_v52 = vpop.permute.xlu2 %500 }
 0x1e8   : > { %v454_v50 = vpop.permute.xlu0 %453  ;;  %v469_v55 = vpop.permute.xlu2 %468 }
 0x1e9   : > { %457 = vst.msk [vmem:[%s755_s6] sm:$0xff] %vm456_vm15, %v454_v50  ;;  %v489_v51 = vpop.permute.xlu1 %488 }
 0x1ea   : > { %491 = vst.msk [vmem:[%s755_s6 + $0x8] sm:$0xff] %vm445_vm13, %v489_v51 }
 0x1eb   : > { %495 = vst.msk [vmem:[%s755_s6 + $0x8] sm:$0xff] %vm451_vm14, %v493_v49 }
 0x1f0   : > { %v497_v53 = vpop.permute.xlu0 %496  ;;  %v516_v58 = vpop.permute.xlu2 %515 }
 0x1f1   : > { %499 = vst.msk [vmem:[%s755_s6 + $0x8] sm:$0xff] %vm456_vm15, %v497_v53  ;;  %v459_v54 = vpop.permute.xlu1 %458 }
 0x1f2   : > { %462 = vst.msk [vmem:[%s755_s6] sm:$0xff] %vm461_vm0, %v459_v54 }
 0x1f3   : > { %503 = vst.msk [vmem:[%s755_s6 + $0x8] sm:$0xff] %vm461_vm0, %v501_v52 }
 0x1f8   : > { %v464_v56 = vpop.permute.xlu0 %463  ;;  %v482_v63 = vpop.permute.xlu2 %481 }
 0x1f9   : > { %467 = vst.msk [vmem:[%s755_s6] sm:$0xff] %vm466_vm1, %v464_v56  ;;  %v505_v57 = vpop.permute.xlu1 %504 }
 0x1fa   : > { %507 = vst.msk [vmem:[%s755_s6 + $0x8] sm:$0xff] %vm466_vm1, %v505_v57 }
 0x1fb   : > { %472 = vst.msk [vmem:[%s755_s6] sm:$0xff] %vm471_vm2, %v469_v55 }
 0x200   : > { %v509_v59 = vpop.permute.xlu0 %508 }
 0x201   : > { %511 = vst.msk [vmem:[%s755_s6 + $0x8] sm:$0xff] %vm471_vm2, %v509_v59  ;;  %v514_v60 = vpop.permute.xlu1 %513 }
 0x202   : > { %v518_v61 = vsel %vm517_vm3, %v514_v60, %v516_v58 }
 0x203   : > { %520 = vst.msk [vmem:[%s755_s6 + $0x8] sm:$0xff] %vm476_vm4, %v518_v61 }
 0x208   : > { %v474_v62 = vpop.permute.xlu0 %473 }
 0x209   : > { %477 = vst.msk [vmem:[%s755_s6] sm:$0xff] %vm476_vm4, %v474_v62  ;;  %v480_v0 = vpop.permute.xlu1 %479 }
 0x20a   : > { %v484_v1 = vsel %vm483_vm5, %v480_v0, %v482_v63 }
 0x20b   : > { %487 = vst.msk [vmem:[%s755_s6] sm:$0xff] %vm486_vm6, %v484_v1 }
 0x210   : > { %v522_v2 = vpop.permute.xlu0 %521 }
 0x211   : > { %524 = vst.msk [vmem:[%s755_s6 + $0x8] sm:$0xff] %vm486_vm6, %v522_v2 }
 0x212 PF: > { %s13_s12 = sadd.s32 1, %s662_s12  }
 0x213   : > { %p10_p4 = scmp.ge.s32.totalorder %s13_s12, 4  }
 0x215   :  { %12 = sbr.rel (!%p10_p4) target bundleno = 1 (0x1), region = 66 }

</bundles_post_ra>
